<compile_context>
chip_gen: v5e
topology: v5e:2x2
jax: 0.10.0
libtpu: 0.0.40
codegen_flags: <defaults>
</compile_context>

<pallas_src>
import jax
import jax.numpy as jnp
from jax.experimental import pallas as pl
from jax.experimental.pallas import tpu as pltpu


def _round_up(x, m):
    return ((x + m - 1) // m) * m


def meanmax_kernel(x_ref, o_ref):
    # x_ref: (tn, K, F) tile in VMEM; o_ref: (tn, 2F) tile in VMEM.
    K = x_ref.shape[1]
    F = x_ref.shape[2]
    x = x_ref[...]                                        # (tn, K, F)

    # Mean over K: accumulate in f32, multiply by the compile-time constant 1/K.
    mean_agg = jnp.sum(x.astype(jnp.float32), axis=1) * (1.0 / K)   # (tn, F)
    # Max over K in the native dtype (matches torch.max(..., dim=1)[0]).
    max_agg = jnp.max(x, axis=1)                                    # (tn, F)

    # Two direct slice stores instead of a concatenate (no extra temporary).
    o_ref[:, :F] = mean_agg.astype(o_ref.dtype)
    o_ref[:, F:] = max_agg.astype(o_ref.dtype)


def meanmax_aggregation(feat_dist, *, tn=None, vmem_limit_bytes=32 * 1024 * 1024):
    """feat_dist: [N, K, F] -> [N, 2F] (mean || max over the K axis)."""
    N, K, F = feat_dist.shape
    itemsize = jnp.dtype(feat_dist.dtype).itemsize
    # Sublane multiple for the node axis (second-to-last dim of the output block).
    sub = {4: 8, 2: 16, 1: 32}.get(itemsize, 8)

    if tn is None:
        # VMEM bytes per node, accounting for lane/sublane padding of the tiles,
        # and double buffering of both input and output blocks.
        pad_f = _round_up(F, 128)
        pad_k = _round_up(K, sub)
        in_bytes_per_node = pad_k * pad_f * itemsize
        out_bytes_per_node = _round_up(2 * F, 128) * itemsize
        per_node = 2 * (in_bytes_per_node + out_bytes_per_node)
        budget = vmem_limit_bytes // 2          # headroom under the scoped limit
        tn = max(sub, (budget // per_node) // sub * sub)

    # Never make the tile larger than the (padded) problem; keep it sublane-aligned.
    tn = min(tn, _round_up(N, sub))
    tn = max(sub, (tn // sub) * sub)

    grid = (pl.cdiv(N, tn),)

    return pl.pallas_call(
        meanmax_kernel,
        out_shape=jax.ShapeDtypeStruct((N, 2 * F), feat_dist.dtype),
        grid_spec=pltpu.PrefetchScalarGridSpec(
            num_scalar_prefetch=0,
            grid=grid,
            in_specs=[
                # One tile of tn nodes, all K messages, full feature dim.
                # K and F equal the full array dims, so the (8,128) block
                # constraint is satisfied for any K, F; the HBM side of each
                # DMA is a single contiguous slab of tn*K*F elements.
                pl.BlockSpec((tn, K, F), lambda i: (i, 0, 0)),
            ],
            out_specs=pl.BlockSpec((tn, 2 * F), lambda i: (i, 0)),
        ),
        compiler_params=pltpu.CompilerParams(
            dimension_semantics=("parallel",),   # shards across v7x's 2 TCs
            vmem_limit_bytes=vmem_limit_bytes,
        ),
    )(feat_dist)


def meanmax_reference(feat_dist):
    mean_agg = jnp.mean(feat_dist.astype(jnp.float32), axis=1).astype(feat_dist.dtype)
    max_agg = jnp.max(feat_dist, axis=1)
    return jnp.concatenate([mean_agg, max_agg], axis=-1)


if __name__ == "__main__":
    key = jax.random.PRNGKey(0)

    # Small, deterministic example: 16 nodes, 8 neighbors each, 32 features.
    N, K, F = 16, 8, 32
    feat_dist = jax.random.normal(key, (N, K, F), dtype=jnp.float32)

    out = meanmax_aggregation(feat_dist)
    out = jax.block_until_ready(out)
    ref = meanmax_reference(feat_dist)
    assert out.shape == (N, 2 * F)
    assert jnp.allclose(out, ref, atol=1e-5, rtol=1e-5)

    # Tail-block check: N not a multiple of the tile size (forces a masked tail).
    N2 = 40
    feat_dist2 = jax.random.normal(jax.random.PRNGKey(1), (N2, K, F), dtype=jnp.float32)
    out2 = jax.block_until_ready(meanmax_aggregation(feat_dist2, tn=16))
    ref2 = meanmax_reference(feat_dist2)
    assert out2.shape == (N2, 2 * F)
    assert jnp.allclose(out2, ref2, atol=1e-5, rtol=1e-5)

    print("KERNEL_OK")
</pallas_src>

<mosaic_0001>
module attributes {stable_mosaic.version = 11 : i64} {
  func.func @meanmax_kernel(%arg0: i32, %arg1: memref<16x8x32xf32, #tpu.memory_space<vmem>>, %arg2: memref<16x64xf32, #tpu.memory_space<vmem>>) attributes {dimension_semantics = [#tpu.dimension_semantics<parallel>], iteration_bounds = array<i64: 1>, scalar_prefetch = 0 : i64, scratch_operands = 0 : i64, tpu.core_type = #tpu.core_type<tc>, window_params = [{transform_indices = @transform_0, window_bounds = array<i64: 16, 8, 32>}, {transform_indices = @transform_1, window_bounds = array<i64: 16, 64>}]} {
    %c0 = arith.constant 0 : index
    %c0_0 = arith.constant 0 : index
    %c0_1 = arith.constant 0 : index
    %0 = vector.load %arg1[%c0, %c0_0, %c0_1] : memref<16x8x32xf32, #tpu.memory_space<vmem>>, vector<16x8x32xf32>
    %cst = arith.constant dense<0.000000e+00> : vector<16x32xf32>
    %1 = vector.multi_reduction <add>, %0, %cst [1] : vector<16x8x32xf32> to vector<16x32xf32>
    %cst_2 = arith.constant 1.250000e-01 : f32
    %2 = vector.broadcast %cst_2 : f32 to vector<16x32xf32>
    %3 = arith.mulf %1, %2 : vector<16x32xf32>
    %cst_3 = arith.constant dense<0xFF800000> : vector<16x32xf32>
    %4 = vector.multi_reduction <maximumf>, %0, %cst_3 [1] : vector<16x8x32xf32> to vector<16x32xf32>
    %c0_4 = arith.constant 0 : index
    %c0_5 = arith.constant 0 : index
    %5 = vector.load %arg2[%c0_4, %c0_5] : memref<16x64xf32, #tpu.memory_space<vmem>>, vector<16x32xf32>
    tpu.vector_store %arg2[%c0_4, %c0_5], %3 {strides = array<i32>} : memref<16x64xf32, #tpu.memory_space<vmem>>, vector<16x32xf32>,
    %c0_6 = arith.constant 0 : index
    %c32 = arith.constant 32 : index
    %6 = vector.load %arg2[%c0_6, %c32] : memref<16x64xf32, #tpu.memory_space<vmem>>, vector<16x32xf32>
    tpu.vector_store %arg2[%c0_6, %c32], %4 {strides = array<i32>} : memref<16x64xf32, #tpu.memory_space<vmem>>, vector<16x32xf32>,
    return
  }
  func.func @transform_0(%arg0: i32) -> (i32, i32, i32) {
    %c0_i32 = arith.constant 0 : i32
    %c0_i32_0 = arith.constant 0 : i32
    %c0_i32_1 = arith.constant 0 : i32
    return %arg0, %c0_i32, %c0_i32_0 : i32, i32, i32
  }
  func.func @transform_1(%arg0: i32) -> (i32, i32) {
    %c0_i32 = arith.constant 0 : i32
    %c0_i32_0 = arith.constant 0 : i32
    return %arg0, %c0_i32 : i32, i32
  }
}

</mosaic_0001>

<bundles_post_ra>
// kernel: tpu_custom_call.1
= control target key start
LH: loop header
LB: loop body
LE: loop exit
PB: predicated region body
PF: predicated region fallthrough
CT: control target
= control target key end

     0   :  { %6 = vsyncpa [#allocation3], 0  ;;  %s642_s0 = inlined_call_operand.hbm [shape: f32[16,8,32], index: 0, kind: input, shape index: {}]   ;;  %s643_s1 = inlined_call_operand.hbm [shape: f32[16,64], index: 1, kind: output, shape index: {}]  }
   0x1   :  { %7 = vsyncpa [#allocation4], 0  ;;  %s12_s8 = sshll.u32 %s642_s0, 4  ;;  %s438_s9 = smov [#allocation2]   ;;  %s13_s8 = int_to_ptr.hbm [resolvable:$true] %s12_s8 }
   0x2   :  { %s14_s10 = sshll.u32 %s438_s9, 4  ;;  %s439_s11 = smov 128   ;;  %s15_s10 = int_to_ptr.vmem [resolvable:$true] %s14_s10 }
   0x3   :  { %s440_s12 = smov 8  }
   0x4   :  { %20 = dma.hbm_to_vmem [thread:$0]  %s13_s8, 2048, %s15_s10, [#allocation3], %s439_s11, %s439_s11, %s440_s12  }
   0x5   :  { %434 = dma.done.wait [#allocation3], 2048  }
   0x6   :  { %435 = vsyncadd [#allocation3], 4294965248  ;;  %v459_v0 = vld [vmem:[#allocation2] sm:$0xff]  ;;  %v461_v1 = vld [vmem:[#allocation2 + $0x8] sm:$0xff]  ;;  %vm41_vm0 = vcmask 261120   ;;  %vm298_vm1 = vcmask 1041409  }
   0x7   :  { %v463_v2 = vld [vmem:[#allocation2 + $0x10] sm:$0xff]  ;;  %v465_v3 = vld [vmem:[#allocation2 + $0x18] sm:$0xff]  ;;  %v49_v4 = vsel %vm41_vm0, %v461_v1, 0.0  ;;  %v471_v6 = vld [vmem:[#allocation2 + $0x20] sm:$0xff]  ;;  %v483_v14 = vsel %vm41_vm0, %v459_v0, -inf  ;;  %vm300_vm2 = vcmask 1042434  }
   0x8   :  { %v56_v5 = vsel %vm41_vm0, %v463_v2, 0.0  ;;  %v473_v7 = vld [vmem:[#allocation2 + $0x28] sm:$0xff]  ;;  %v50_v8 = vrot.slane %v49_v4, 4  ;;  %v63_v10 = vsel %vm41_vm0, %v465_v3, 0.0  ;;  %v70_v12 = vsel %vm41_vm0, %v471_v6, 0.0  ;;  %v485_v15 = vld [vmem:[#allocation2 + $0x30] sm:$0xff] }
   0x9   :  { %v57_v9 = vrot.slane %v56_v5, 4  ;;  %v64_v11 = vrot.slane %v63_v10, 4  ;;  %v77_v13 = vsel %vm41_vm0, %v473_v7, 0.0  ;;  %v487_v16 = vld [vmem:[#allocation2 + $0x38] sm:$0xff]  ;;  %v489_v17 = vld [vmem:[#allocation2 + $0x40] sm:$0xff]  ;;  %v71_v20 = vrot.slane %v70_v12, 4 }
   0xa   :  { %v51_v18 = vadd.f32 %v50_v8, %v49_v4  ;;  %v78_v21 = vrot.slane %v77_v13, 4  ;;  %v84_v23 = vsel %vm41_vm0, %v485_v15, 0.0  ;;  %v91_v24 = vsel %vm41_vm0, %v487_v16, 0.0  ;;  %v497_v54 = vld [vmem:[#allocation2 + $0x48] sm:$0xff]  ;;  %v499_v55 = vld [vmem:[#allocation2 + $0x50] sm:$0xff]  ;;  %v501_v60 = vld [vmem:[#allocation2 + $0x58] sm:$0xff] }
   0xb   :  { %v58_v19 = vadd.f32 %v57_v9, %v56_v5  ;;  %v65_v22 = vadd.f32 %v64_v11, %v63_v10  ;;  %v98_v25 = vsel %vm41_vm0, %v489_v17, 0.0  ;;  %v72_v28 = vadd.f32 %v71_v20, %v70_v12  ;;  %v507_v5 = vld [vmem:[#allocation2 + $0x60] sm:$0xff]  ;;  %v509_v8 = vld [vmem:[#allocation2 + $0x68] sm:$0xff]  ;;  %s441_s0 = smov 32   ;;  %s442_s13 = smov [#allocation5]  }
   0xc   :  { %v52_v26 = vrot.slane %v51_v18, 2  ;;  %v79_v29 = vadd.f32 %v78_v21, %v77_v13  ;;  %v85_v31 = vrot.slane %v84_v23, 4  ;;  %v92_v32 = vrot.slane %v91_v24, 4  ;;  %s366_s14 = sshll.u32 %s442_s13, 4  ;;  %s368_s17 = sshll.u32 %s643_s1, 4  ;;  %s367_s14 = int_to_ptr.vmem [resolvable:$true] %s366_s14  ;;  %s369_s17 = int_to_ptr.hbm [resolvable:$true] %s368_s17 }
   0xd   :  { %v59_v27 = vrot.slane %v58_v19, 2  ;;  %v66_v30 = vrot.slane %v65_v22, 2  ;;  %v99_v33 = vrot.slane %v98_v25, 4  ;;  %v73_v36 = vrot.slane %v72_v28, 2 }
   0xe   :  { %v53_v34 = vadd.f32 %v52_v26, %v51_v18  ;;  %v80_v37 = vrot.slane %v79_v29, 2  ;;  %v86_v39 = vadd.f32 %v85_v31, %v84_v23  ;;  %v93_v40 = vadd.f32 %v92_v32, %v91_v24  ;;  %v519_v26 = vld [vmem:[#allocation2 + $0x78] sm:$0xff] }
   0xf   :  { %v60_v35 = vadd.f32 %v59_v27, %v58_v19  ;;  %v67_v38 = vadd.f32 %v66_v30, %v65_v22  ;;  %v100_v41 = vadd.f32 %v99_v33, %v98_v25  ;;  %v74_v44 = vadd.f32 %v73_v36, %v72_v28  ;;  %v517_v25 = vld [vmem:[#allocation2 + $0x70] sm:$0xff] }
  0x10   :  { %v54_v42 = vrot.slane %v53_v34, 1  ;;  %v81_v45 = vadd.f32 %v80_v37, %v79_v29  ;;  %v87_v47 = vrot.slane %v86_v39, 2  ;;  %v94_v48 = vrot.slane %v93_v40, 2 }
  0x11   :  { %v61_v43 = vrot.slane %v60_v35, 1  ;;  %v68_v46 = vrot.slane %v67_v38, 1  ;;  %v101_v49 = vrot.slane %v100_v41, 2  ;;  %v75_v52 = vrot.slane %v74_v44, 1 }
  0x12   :  { %v55_v50 = vadd.f32 %v54_v42, %v53_v34  ;;  %v82_v53 = vrot.slane %v81_v45, 1  ;;  %v88_v57 = vadd.f32 %v87_v47, %v86_v39  ;;  %v95_v58 = vadd.f32 %v94_v48, %v93_v40 }
  0x13   :  { %v62_v51 = vadd.f32 %v61_v43, %v60_v35  ;;  %v69_v56 = vadd.f32 %v68_v46, %v67_v38  ;;  %v102_v59 = vadd.f32 %v101_v49, %v100_v41  ;;  %v76_v61 = vadd.f32 %v75_v52, %v74_v44 }
  0x14   :  { %v83_v62 = vadd.f32 %v82_v53, %v81_v45  ;;  %v105_v63 = vsel %vm41_vm0, %v497_v54, 0.0  ;;  %v112_v4 = vsel %vm41_vm0, %v499_v55, 0.0  ;;  %v89_v9 = vrot.slane %v88_v57, 1 }
  0x15   :  { %v96_v10 = vrot.slane %v95_v58, 1  ;;  %v103_v11 = vrot.slane %v102_v59, 1  ;;  %v106_v12 = vrot.slane %v105_v63, 4  ;;  %v113_v13 = vrot.slane %v112_v4, 4 }
  0x16   :  { %v119_v18 = vsel %vm41_vm0, %v501_v60, 0.0  ;;  %v126_v19 = vsel %vm41_vm0, %v507_v5, 0.0  ;;  %v133_v20 = vsel %vm41_vm0, %v509_v8, 0.0  ;;  %v90_v21 = vadd.f32 %v89_v9, %v88_v57 }
  0x17   :  { %v97_v22 = vadd.f32 %v96_v10, %v95_v58  ;;  %v104_v23 = vadd.f32 %v103_v11, %v102_v59  ;;  %v107_v24 = vadd.f32 %v106_v12, %v105_v63  ;;  %v114_v27 = vadd.f32 %v113_v13, %v112_v4 }
  0x18   :  { %v120_v28 = vrot.slane %v119_v18, 4  ;;  %v127_v29 = vrot.slane %v126_v19, 4  ;;  %v134_v30 = vrot.slane %v133_v20, 4  ;;  %v140_v32 = vsel %vm41_vm0, %v517_v25, 0.0 }
  0x19   :  { %v108_v31 = vrot.slane %v107_v24, 2  ;;  %v147_v33 = vsel %vm41_vm0, %v519_v26, 0.0  ;;  %v525_v34 = vmul.f32 0.125, %v55_v50  ;;  %v115_v35 = vrot.slane %v114_v27, 2 }
  0x1a   :  { %v121_v36 = vadd.f32 %v120_v28, %v119_v18  ;;  %v128_v37 = vadd.f32 %v127_v29, %v126_v19  ;;  %v135_v38 = vadd.f32 %v134_v30, %v133_v20  ;;  %v141_v40 = vrot.slane %v140_v32, 4 }
  0x1b   :  { %v109_v39 = vadd.f32 %v108_v31, %v107_v24  ;;  %v148_v41 = vrot.slane %v147_v33, 4  ;;  %v527_v42 = vmul.f32 0.125, %v62_v51  ;;  %v116_v43 = vadd.f32 %v115_v35, %v114_v27 }
  0x1c   :  { %v122_v44 = vrot.slane %v121_v36, 2  ;;  %v129_v45 = vrot.slane %v128_v37, 2  ;;  %v136_v46 = vrot.slane %v135_v38, 2  ;;  %v142_v48 = vadd.f32 %v141_v40, %v140_v32 }
  0x1d   :  { %v110_v47 = vrot.slane %v109_v39, 1  ;;  %v149_v49 = vadd.f32 %v148_v41, %v147_v33  ;;  %v529_v52 = vmul.f32 0.125, %v69_v56  ;;  %v117_v50 = vrot.slane %v116_v43, 1 }
  0x1e   :  { %v123_v53 = vadd.f32 %v122_v44, %v121_v36  ;;  %v130_v57 = vadd.f32 %v129_v45, %v128_v37  ;;  %v137_v58 = vadd.f32 %v136_v46, %v135_v38  ;;  %v143_v63 = vrot.slane %v142_v48, 2 }
  0x1f   :  { %v111_v59 = vadd.f32 %v110_v47, %v109_v39  ;;  %v150_v4 = vrot.slane %v149_v49, 2  ;;  %v531_v9 = vmul.f32 0.125, %v76_v61  ;;  %v118_v51 = vadd.f32 %v117_v50, %v116_v43 }
  0x20   :  { %v124_v10 = vrot.slane %v123_v53, 1  ;;  %v131_v11 = vrot.slane %v130_v57, 1  ;;  %v138_v12 = vrot.slane %v137_v58, 1  ;;  %v144_v13 = vadd.f32 %v143_v63, %v142_v48 }
  0x21   :  { %v151_v18 = vadd.f32 %v150_v4, %v149_v49  ;;  %v533_v19 = vmul.f32 0.125, %v83_v62  ;;  %v535_v20 = vmul.f32 0.125, %v90_v21  ;;  %v537_v28 = vmul.f32 0.125, %v97_v22 }
  0x22   :  { %v125_v56 = vadd.f32 %v124_v10, %v123_v53  ;;  %v132_v24 = vadd.f32 %v131_v11, %v130_v57  ;;  %v139_v27 = vadd.f32 %v138_v12, %v137_v58  ;;  %v145_v29 = vrot.slane %v144_v13, 1 }
  0x23   :  { %v152_v30 = vrot.slane %v151_v18, 1  ;;  %v539_v31 = vmul.f32 0.125, %v104_v23  ;;  %v541_v61 = vmul.f32 0.125, %v111_v59  ;;  %v543_v32 = vmul.f32 0.125, %v118_v51 }
  0x24   :  { %v545_v33 = vmul.f32 0.125, %v125_v56  ;;  %v547_v35 = vmul.f32 0.125, %v132_v24  ;;  %v549_v62 = vmul.f32 0.125, %v139_v27  ;;  %v146_v21 = vadd.f32 %v145_v29, %v144_v13 }
  0x25   :  { %v153_v36 = vadd.f32 %v152_v30, %v151_v18  ;;  %v171_v37 = vrot.slane %v483_v14, 4  ;;  %v177_v22 = vsel %vm41_vm0, %v461_v1, -inf  ;;  %v184_v23 = vsel %vm41_vm0, %v463_v2, -inf }
  0x26   :  { %v178_v38 = vrot.slane %v177_v22, 4  ;;  %v191_v39 = vsel %vm41_vm0, %v465_v3, -inf  ;;  %v198_v40 = vsel %vm41_vm0, %v471_v6, -inf  ;;  %v560_v41 = vmul.f32 0.125, %v146_v21 }
  0x27   :  { %v562_v43 = vmul.f32 0.125, %v153_v36  ;;  %v172_v44 = vmax.f32 %v483_v14, %v171_v37  ;;  %v185_v45 = vrot.slane %v184_v23, 4  ;;  %v192_v47 = vrot.slane %v191_v39, 4 }
  0x28   :  { %v179_v46 = vmax.f32 %v177_v22, %v178_v38  ;;  %v199_v1 = vrot.slane %v198_v40, 4  ;;  %v205_v48 = vsel %vm41_vm0, %v473_v7, -inf  ;;  %v212_v3 = vsel %vm41_vm0, %v485_v15, -inf }
  0x29   :  { %v173_v2 = vrot.slane %v172_v44, 2  ;;  %v186_v49 = vmax.f32 %v184_v23, %v185_v45  ;;  %v206_v50 = vrot.slane %v205_v48, 4  ;;  %v193_v53 = vmax.f32 %v191_v39, %v192_v47 }
  0x2a   :  { %v180_v6 = vrot.slane %v179_v46, 2  ;;  %v200_v57 = vmax.f32 %v198_v40, %v199_v1  ;;  %v213_v58 = vrot.slane %v212_v3, 4  ;;  %v219_v4 = vsel %vm41_vm0, %v487_v16, -inf }
  0x2b   :  { %v174_v59 = vmax.f32 %v172_v44, %v173_v2  ;;  %v187_v63 = vrot.slane %v186_v49, 2  ;;  %v207_v14 = vmax.f32 %v205_v48, %v206_v50  ;;  %v194_v10 = vrot.slane %v193_v53, 2 }
  0x2c   :  { %v181_v51 = vmax.f32 %v179_v46, %v180_v6  ;;  %v201_v11 = vrot.slane %v200_v57, 2  ;;  %v214_v7 = vmax.f32 %v212_v3, %v213_v58  ;;  %v220_v56 = vrot.slane %v219_v4, 4 }
  0x2d   :  { %v175_v12 = vrot.slane %v174_v59, 1  ;;  %v188_v13 = vmax.f32 %v186_v49, %v187_v63  ;;  %v208_v18 = vrot.slane %v207_v14, 2  ;;  %v195_v15 = vmax.f32 %v193_v53, %v194_v10 }
  0x2e   :  { %v182_v24 = vrot.slane %v181_v51, 1  ;;  %v202_v27 = vmax.f32 %v200_v57, %v201_v11  ;;  %v215_v29 = vrot.slane %v214_v7, 2  ;;  %v221_v37 = vmax.f32 %v219_v4, %v220_v56 }
  0x2f   :  { %v176_v30 = vmax.f32 %v174_v59, %v175_v12  ;;  %v189_v21 = vrot.slane %v188_v13, 1  ;;  %v209_v36 = vmax.f32 %v207_v14, %v208_v18  ;;  %v196_v38 = vrot.slane %v195_v15, 1 }
  0x30   :  { %v183_v22 = vmax.f32 %v181_v51, %v182_v24  ;;  %v203_v23 = vrot.slane %v202_v27, 1  ;;  %v216_v16 = vmax.f32 %v214_v7, %v215_v29  ;;  %v222_v44 = vrot.slane %v221_v37, 2 }
  0x31   :  { %v190_v39 = vmax.f32 %v188_v13, %v189_v21  ;;  %v210_v40 = vrot.slane %v209_v36, 1  ;;  %v197_v45 = vmax.f32 %v195_v15, %v196_v38  ;;  %vm302_vm3 = vcmask 1043459  }
  0x32   :  { %v204_v46 = vmax.f32 %v202_v27, %v203_v23  ;;  %v217_v47 = vrot.slane %v216_v16, 1  ;;  %v223_v48 = vmax.f32 %v221_v37, %v222_v44  ;;  %vm304_vm4 = vcmask 1044484  }
  0x33   :  { %v211_v1 = vmax.f32 %v209_v36, %v210_v40  ;;  %vm306_vm5 = vcmask 1045509   ;;  %vm308_vm6 = vcmask 1046534   ;;  %vm310_vm7 = vcmask 1047559  }
  0x34   :  { %v218_v2 = vmax.f32 %v216_v16, %v217_v47  ;;  %v224_v49 = vrot.slane %v223_v48, 1  ;;  %v312_v50 = vsel %vm298_vm1, %v541_v61, %v539_v31  ;;  %v339_v3 = vsel %vm298_vm1, %v183_v22, %v176_v30 }
  0x35   :  { %v42_v6 = vsel %vm41_vm0, %v459_v0, 0.0  ;;  %v313_v53 = vsel %vm300_vm2, %v543_v32, %v312_v50  ;;  %v340_v57 = vsel %vm300_vm2, %v190_v39, %v339_v3  ;;  %v226_v59 = vsel %vm41_vm0, %v489_v17, -inf }
  0x36   :  { %v43_v58 = vrot.slane %v42_v6, 4  ;;  %v225_v63 = vmax.f32 %v223_v48, %v224_v49  ;;  %v314_v14 = vsel %vm302_vm3, %v545_v33, %v313_v53  ;;  %v341_v31 = vsel %vm302_vm3, %v197_v45, %v340_v57 }
  0x37   :  { %v227_v61 = vrot.slane %v226_v59, 4  ;;  %v315_v4 = vsel %vm304_vm4, %v547_v35, %v314_v14  ;;  %v342_v0 = vsel %vm304_vm4, %v204_v46, %v341_v31  ;;  %v233_v32 = vsel %vm41_vm0, %v497_v54, -inf }
  0x38   :  { %v44_v51 = vadd.f32 %v43_v58, %v42_v6  ;;  %v316_v10 = vsel %vm306_vm5, %v549_v62, %v315_v4  ;;  %v343_v17 = vsel %vm306_vm5, %v211_v1, %v342_v0  ;;  %v234_v7 = vrot.slane %v233_v32, 4 }
  0x39   :  { %v228_v11 = vmax.f32 %v226_v59, %v227_v61  ;;  %v317_v33 = vsel %vm308_vm6, %v560_v41, %v316_v10  ;;  %v344_v12 = vsel %vm308_vm6, %v218_v2, %v343_v17  ;;  %v240_v35 = vsel %vm41_vm0, %v499_v55, -inf }
  0x3a   :  { %v45_v13 = vrot.slane %v44_v51, 2  ;;  %v318_v18 = vsel %vm310_vm7, %v562_v43, %v317_v33  ;;  %v345_v54 = vsel %vm310_vm7, %v225_v63, %v344_v12  ;;  %v235_v62 = vmax.f32 %v233_v32, %v234_v7 }
  0x3b   :  { %v229_v56 = vrot.slane %v228_v11, 2  ;;  %353 = vrot.lane.b32.xlu0 %v345_v54, %s441_s0  ;;  %322 = vst.msk [vmem:[#allocation5 + $0x8] sm:$0xff] %vm41_vm0, %v318_v18  ;;  %v241_v41 = vrot.slane %v240_v35, 4  ;;  %v247_v15 = vsel %vm41_vm0, %v501_v60, -inf  ;;  %v254_v55 = vsel %vm41_vm0, %v507_v5, -inf }
  0x3c   :  { %v46_v24 = vadd.f32 %v45_v13, %v44_v51  ;;  %v236_v29 = vrot.slane %v235_v62, 2  ;;  %v248_v43 = vrot.slane %v247_v15, 4  ;;  %v255_v30 = vrot.slane %v254_v55, 4 }
  0x3d   :  { %v230_v27 = vmax.f32 %v228_v11, %v229_v56  ;;  %v242_v36 = vmax.f32 %v240_v35, %v241_v41  ;;  %v261_v37 = vsel %vm41_vm0, %v509_v8, -inf  ;;  %v268_v22 = vsel %vm41_vm0, %v517_v25, -inf }
  0x3e   :  { %v47_v21 = vrot.slane %v46_v24, 1  ;;  %v237_v23 = vmax.f32 %v235_v62, %v236_v29  ;;  %v249_v16 = vmax.f32 %v247_v15, %v248_v43  ;;  %v256_v39 = vmax.f32 %v254_v55, %v255_v30 }
  0x3f   :  { %v231_v38 = vrot.slane %v230_v27, 1  ;;  %v243_v40 = vrot.slane %v242_v36, 2  ;;  %v262_v44 = vrot.slane %v261_v37, 4  ;;  %v269_v5 = vrot.slane %v268_v22, 4 }
  0x40   :  { %v48_v60 = vadd.f32 %v47_v21, %v46_v24  ;;  %v238_v46 = vrot.slane %v237_v23, 1  ;;  %v250_v47 = vrot.slane %v249_v16, 2  ;;  %v257_v1 = vrot.slane %v256_v39, 2 }
  0x41   :  { %v232_v45 = vmax.f32 %v230_v27, %v231_v38  ;;  %v244_v2 = vmax.f32 %v242_v36, %v243_v40  ;;  %v263_v49 = vmax.f32 %v261_v37, %v262_v44  ;;  %v270_v50 = vmax.f32 %v268_v22, %v269_v5 }
  0x42   :  { %v154_v48 = vmul.f32 0.125, %v48_v60  ;;  %v239_v8 = vmax.f32 %v237_v23, %v238_v46  ;;  %v251_v3 = vmax.f32 %v249_v16, %v250_v47  ;;  %v258_v6 = vmax.f32 %v256_v39, %v257_v1 }
  0x43   :  { %v275_v25 = vsel %vm41_vm0, %v519_v26, -inf  ;;  %v245_v57 = vrot.slane %v244_v2, 1  ;;  %v264_v58 = vrot.slane %v263_v49, 2  ;;  %v271_v59 = vrot.slane %v270_v50, 2 }
  0x44   :  { %v299_v53 = vsel %vm298_vm1, %v525_v34, %v154_v48  ;;  %v252_v14 = vrot.slane %v251_v3, 1  ;;  %v259_v31 = vrot.slane %v258_v6, 1  ;;  %v276_v61 = vrot.slane %v275_v25, 4 }
  0x45   :  { %v301_v63 = vsel %vm300_vm2, %v527_v42, %v299_v53  ;;  %v246_v0 = vmax.f32 %v244_v2, %v245_v57  ;;  %v265_v51 = vmax.f32 %v263_v49, %v264_v58  ;;  %v272_v32 = vmax.f32 %v270_v50, %v271_v59 }
  0x46   :  { %v303_v4 = vsel %vm302_vm3, %v529_v52, %v301_v63  ;;  %v253_v10 = vmax.f32 %v251_v3, %v252_v14  ;;  %v260_v34 = vmax.f32 %v258_v6, %v259_v31  ;;  %v277_v17 = vmax.f32 %v275_v25, %v276_v61 }
  0x47   :  { %v305_v26 = vsel %vm304_vm4, %v531_v9, %v303_v4  ;;  %v266_v7 = vrot.slane %v265_v51, 1  ;;  %v273_v42 = vrot.slane %v272_v32, 1  ;;  %v346_v33 = vsel %vm298_vm1, %v239_v8, %v232_v45 }
  0x48   :  { %v307_v11 = vsel %vm306_vm5, %v533_v19, %v305_v26  ;;  %v278_v52 = vrot.slane %v277_v17, 2  ;;  %v347_v13 = vsel %vm300_vm2, %v246_v0, %v346_v33  ;;  %vm359_vm8 = vcmask 523520  }
  0x49   :  { %v309_v12 = vsel %vm308_vm6, %v535_v20, %v307_v11  ;;  %v267_v9 = vmax.f32 %v265_v51, %v266_v7  ;;  %v274_v18 = vmax.f32 %v272_v32, %v273_v42  ;;  %v348_v54 = vsel %vm302_vm3, %v253_v10, %v347_v13 }
  0x4a   :  { %v311_v35 = vsel %vm310_vm7, %v537_v28, %v309_v12  ;;  %v279_v19 = vmax.f32 %v277_v17, %v278_v52  ;;  %v349_v56 = vsel %vm304_vm4, %v260_v34, %v348_v54 }
  0x4b   :  { %321 = vst.msk [vmem:[#allocation5] sm:$0xff] %vm41_vm0, %v311_v35  ;;  %v350_v62 = vsel %vm306_vm5, %v267_v9, %v349_v56 }
  0x4c   :  { %v280_v24 = vrot.slane %v279_v19, 1  ;;  %v351_v20 = vsel %vm308_vm6, %v274_v18, %v350_v62 }
  0x4e   :  { %v281_v41 = vmax.f32 %v279_v19, %v280_v24 }
  0x50   :  { %v352_v15 = vsel %vm310_vm7, %v281_v41, %v351_v20 }
  0x51   :  { %355 = vrot.lane.b32.xlu0 %v352_v15, %s441_s0 }
  0xad   :  { %v354_v28 = vpop.permute.xlu0 %353 }
  0xae   :  { %360 = vst.msk [vmem:[#allocation5] sm:$0xff] %vm359_vm8, %v354_v28 }
  0xc3   :  { %v356_v55 = vpop.permute.xlu0 %355 }
  0xc4   :  { %361 = vst.msk [vmem:[#allocation5 + $0x8] sm:$0xff] %vm359_vm8, %v356_v55 }
  0xc5   :  { %374 = dma.vmem_to_hbm [thread:$0]  %s367_s14, 256, %s369_s17, [#allocation4], %s439_s11, %s439_s11, %s440_s12  }
  0xc6   :  { %436 = dma.done.wait [#allocation4], 256  }
  0xc7   :  { %437 = vsyncadd [#allocation4], 4294967040 }
  0xc8   :  { %379 = vsyncpa [#allocation3], 1 }
  0xc9   :  { %380 = vsyncpa [#allocation4], 1 }

</bundles_post_ra>
